<compile_context>
chip_gen: v5e
topology: v5e:2x2
jax: 0.10.0
libtpu: 0.0.40
codegen_flags: <defaults>
</compile_context>

<pallas_src>
import functools
import math

import jax
import jax.numpy as jnp
from jax.experimental import pallas as pl
from jax.experimental.pallas import tpu as pltpu


# ---------------------------------------------------------------------------
# Fused kernel
#   x      : (b, n, d_in)          f32   (full array, resident)
#   wqkv   : (d_in, 3*d_pad)       bf16  (q|k|v slots, each lane-padded to 128,
#                                         1/sqrt(d_attn) folded into the q slot)
#   bqkv   : (1, 3*d_pad)          f32
#   wp     : (d_pad, d_out)        bf16  (rows >= d_attn are zero)
#   bp     : (1, d_out)            f32
#   o      : (b, tn, d_out)        f32   (query-tiled output)
#   qkv_s  : (b, n, 3*d_pad)       f32   VMEM scratch, persists across grid
# ---------------------------------------------------------------------------
def _tiny_attention_kernel(x_ref, wqkv_ref, bqkv_ref, wp_ref, bp_ref,
                           o_ref, qkv_ref):
    b, n, d_in = x_ref.shape
    tn = o_ref.shape[1]
    d_out = o_ref.shape[2]
    d_pad3 = qkv_ref.shape[2]
    d_pad = d_pad3 // 3

    # ---- Step 0: fused QKV projection for the WHOLE input, done once. ----
    @pl.when(pl.program_id(0) == 0)
    def _():
        x_flat = x_ref[...].reshape(b * n, d_in).astype(jnp.bfloat16)
        qkv = jnp.dot(x_flat, wqkv_ref[...],
                      preferred_element_type=jnp.float32)
        qkv = qkv + bqkv_ref[...]                       # one fused bias add (f32)
        qkv_ref[...] = qkv.reshape(b, n, d_pad3)

    # ---- Per query-tile work (reads the resident scratch). ----
    start = pl.multiple_of(pl.program_id(0) * tn, tn)
    q = qkv_ref[:, pl.ds(start, tn), 0:d_pad]           # (b, tn, d_pad), scale folded in
    k = qkv_ref[:, :, d_pad:2 * d_pad]                  # (b, n,  d_pad)
    v = qkv_ref[:, :, 2 * d_pad:3 * d_pad]              # (b, n,  d_pad)

    # scores: (b, tn, n).  Padded lanes of q/k are zero -> exact 64-d dot.
    w = jnp.einsum('bnd,bmd->bnm',
                   q.astype(jnp.bfloat16), k.astype(jnp.bfloat16),
                   preferred_element_type=jnp.float32)

    # PyTorch nn.Softmax(dim=0): normalize over the BATCH axis (exact here,
    # all batches are in-block).  Element-wise math stays f32.
    w_max = jnp.max(w, axis=0, keepdims=True)
    e = jnp.exp(w - w_max)                               # EUP
    denom = jnp.sum(e, axis=0, keepdims=True)
    a = e * pl.reciprocal(denom, approx=True)            # divide -> EUP slot

    ctx = jnp.einsum('bnm,bmd->bnd',
                     a.astype(jnp.bfloat16), v.astype(jnp.bfloat16),
                     preferred_element_type=jnp.float32)

    out = (jnp.dot(ctx.reshape(b * tn, d_pad).astype(jnp.bfloat16), wp_ref[...],
                   preferred_element_type=jnp.float32)
           + bp_ref[...])
    o_ref[...] = out.reshape(b, tn, d_out).astype(o_ref.dtype)


def tiny_attention(x, packed, *, block_n=128):
    """x: (b, n, d_in) f32, packed: dict from pack_params -> (b, n, d_out) f32."""
    b, n, d_in = x.shape
    d_pad3 = packed["wqkv"].shape[1]
    d_pad = d_pad3 // 3
    d_out = packed["wp"].shape[1]

    tn = n if n <= block_n else block_n
    assert n % tn == 0, "query tiling requires n % tn == 0 (pad n if needed)"
    assert tn == n or tn % 8 == 0
    grid = (n // tn,)

    full2d = lambda i: (0, 0)

    return pl.pallas_call(
        _tiny_attention_kernel,
        out_shape=jax.ShapeDtypeStruct((b, n, d_out), jnp.float32),
        grid_spec=pltpu.PrefetchScalarGridSpec(
            num_scalar_prefetch=0,
            grid=grid,
            in_specs=[
                pl.BlockSpec((b, n, d_in), lambda i: (0, 0, 0)),    # x (once)
                pl.BlockSpec((d_in, d_pad3), full2d),               # wqkv (bf16)
                pl.BlockSpec((1, d_pad3), full2d),                  # bqkv
                pl.BlockSpec((d_pad, d_out), full2d),               # wp (bf16)
                pl.BlockSpec((1, d_out), full2d),                   # bp
            ],
            out_specs=pl.BlockSpec((b, tn, d_out), lambda i: (0, i, 0)),
            scratch_shapes=[pltpu.VMEM((b, n, d_pad3), jnp.float32)],
        ),
        compiler_params=pltpu.CompilerParams(
            # "arbitrary": step 0 writes the qkv scratch read by later steps.
            dimension_semantics=("arbitrary",),
            vmem_limit_bytes=32 * 1024 * 1024,
        ),
    )(x, packed["wqkv"], packed["bqkv"], packed["wp"], packed["bp"])


# ---------------------------------------------------------------------------
# Host-side one-time packing: fused + lane-padded QKV weight, scale folded in,
# MXU-side weights cast to bf16.
# ---------------------------------------------------------------------------
def pack_params(params, d_attn):
    d_in = params["wq"].shape[0]
    d_out = params["wp"].shape[1]
    d_pad = ((d_attn + 127) // 128) * 128
    scale = 1.0 / math.sqrt(d_attn)       # == torch.rsqrt(tensor(d_attn))

    wqkv = jnp.zeros((d_in, 3 * d_pad), jnp.float32)
    wqkv = wqkv.at[:, 0:d_attn].set(params["wq"] * scale)
    wqkv = wqkv.at[:, d_pad:d_pad + d_attn].set(params["wk"])
    wqkv = wqkv.at[:, 2 * d_pad:2 * d_pad + d_attn].set(params["wv"])

    bqkv = jnp.zeros((1, 3 * d_pad), jnp.float32)
    bqkv = bqkv.at[:, 0:d_attn].set(params["bq"] * scale)
    bqkv = bqkv.at[:, d_pad:d_pad + d_attn].set(params["bk"])
    bqkv = bqkv.at[:, 2 * d_pad:2 * d_pad + d_attn].set(params["bv"])

    wp = jnp.zeros((d_pad, d_out), jnp.float32).at[0:d_attn, :].set(params["wp"])

    return {
        "wqkv": wqkv.astype(jnp.bfloat16),
        "bqkv": bqkv,
        "wp": wp.astype(jnp.bfloat16),
        "bp": params["bp"],
    }


# ---------------------------------------------------------------------------
# Pure-JAX reference (mirrors the PyTorch forward, incl. softmax over dim=0)
# ---------------------------------------------------------------------------
def tiny_attention_ref(x, params):
    d_attn = params["wq"].shape[1]
    q = x @ params["wq"] + params["bq"]
    k = x @ params["wk"] + params["bk"]
    v = x @ params["wv"] + params["bv"]
    w = jnp.einsum('bnd,bmd->bnm', q, k, precision=jax.lax.Precision.HIGHEST)
    a = jax.nn.softmax(w * (1.0 / math.sqrt(d_attn)), axis=0)
    ctx = jnp.einsum('bnm,bmd->bnd', a, v, precision=jax.lax.Precision.HIGHEST)
    return ctx @ params["wp"] + params["bp"]


# ---------------------------------------------------------------------------
# Deterministic parameter init (torch Linear weights stored as (in, out))
# ---------------------------------------------------------------------------
def init_params(key, *, d_in, d_attn, d_out):
    ks = jax.random.split(key, 8)
    nrm = lambda k, shape, std: (std * jax.random.normal(k, shape)).astype(jnp.float32)
    sd = 1.0 / math.sqrt(d_in)
    sdp = 1.0 / math.sqrt(d_attn)
    return {
        "wq": nrm(ks[0], (d_in, d_attn), sd), "bq": nrm(ks[1], (1, d_attn), sd),
        "wk": nrm(ks[2], (d_in, d_attn), sd), "bk": nrm(ks[3], (1, d_attn), sd),
        "wv": nrm(ks[4], (d_in, d_attn), sd), "bv": nrm(ks[5], (1, d_attn), sd),
        "wp": nrm(ks[6], (d_attn, d_out), sdp), "bp": nrm(ks[7], (1, d_out), sdp),
    }


if __name__ == "__main__":
    # Small shapes implied by the module: d_attn default 64; d_in = d_out = 128
    # keeps the output stores lane-dense.
    batch, seq, d_in, d_attn = 2, 8, 128, 64
    d_out = d_in

    key = jax.random.PRNGKey(0)
    pkey, xkey = jax.random.split(key)
    params = init_params(pkey, d_in=d_in, d_attn=d_attn, d_out=d_out)
    x = jax.random.normal(xkey, (batch, seq, d_in), jnp.float32)

    packed = pack_params(params, d_attn)          # one-time host-side transform

    fwd = jax.jit(tiny_attention)
    out = fwd(x, packed)
    jax.block_until_ready(out)

    ref = tiny_attention_ref(x, params)
    assert out.shape == (batch, seq, d_out)
    assert bool(jnp.all(jnp.isfinite(out)))
    # bf16 MXU operands vs. HIGHEST-precision reference: tolerance-based check.
    max_err = float(jnp.max(jnp.abs(out - ref)))
    rel_err = float(jnp.linalg.norm(out - ref) / jnp.linalg.norm(ref))
    assert rel_err < 2e-2 and max_err < 5e-2, (max_err, rel_err)
    print("KERNEL_OK")
</pallas_src>

<mosaic_0001>
module attributes {stable_mosaic.version = 11 : i64} {
  func.func @_tiny_attention_kernel(%arg0: i32, %arg1: memref<2x8x128xf32, #tpu.memory_space<vmem>>, %arg2: memref<128x384xbf16, #tpu.memory_space<vmem>>, %arg3: memref<1x384xf32, #tpu.memory_space<vmem>>, %arg4: memref<128x128xbf16, #tpu.memory_space<vmem>>, %arg5: memref<1x128xf32, #tpu.memory_space<vmem>>, %arg6: memref<2x8x128xf32, #tpu.memory_space<vmem>>, %arg7: memref<2x8x384xf32, #tpu.memory_space<vmem>>) attributes {dimension_semantics = [#tpu.dimension_semantics<arbitrary>], iteration_bounds = array<i64: 1>, scalar_prefetch = 0 : i64, scratch_operands = 1 : i64, tpu.core_type = #tpu.core_type<tc>, window_params = [{pipeline_mode = #tpu.pipeline_mode<synchronous>, transform_indices = @transform_0, window_bounds = array<i64: 2, 8, 128>}, {pipeline_mode = #tpu.pipeline_mode<synchronous>, transform_indices = @transform_1, window_bounds = array<i64: 128, 384>}, {pipeline_mode = #tpu.pipeline_mode<synchronous>, transform_indices = @transform_2, window_bounds = array<i64: 1, 384>}, {pipeline_mode = #tpu.pipeline_mode<synchronous>, transform_indices = @transform_3, window_bounds = array<i64: 128, 128>}, {pipeline_mode = #tpu.pipeline_mode<synchronous>, transform_indices = @transform_4, window_bounds = array<i64: 1, 128>}, {transform_indices = @transform_5, window_bounds = array<i64: 2, 8, 128>}]} {
    %c0_i32 = arith.constant 0 : i32
    %0 = arith.cmpi eq, %arg0, %c0_i32 : i32
    %1 = arith.extui %0 : i1 to i32
    %c0_i32_0 = arith.constant 0 : i32
    %2 = arith.cmpi ne, %1, %c0_i32_0 : i32
    scf.if %2 {
      %c0_17 = arith.constant 0 : index
      %c0_18 = arith.constant 0 : index
      %c0_19 = arith.constant 0 : index
      %34 = vector.load %arg1[%c0_17, %c0_18, %c0_19] : memref<2x8x128xf32, #tpu.memory_space<vmem>>, vector<2x8x128xf32>
      %35 = vector.shape_cast %34 : vector<2x8x128xf32> to vector<16x128xf32>
      %36 = arith.truncf %35 : vector<16x128xf32> to vector<16x128xbf16>
      %c0_20 = arith.constant 0 : index
      %c0_21 = arith.constant 0 : index
      %37 = vector.load %arg2[%c0_20, %c0_21] : memref<128x384xbf16, #tpu.memory_space<vmem>>, vector<128x384xbf16>
      %cst_22 = arith.constant dense<0.000000e+00> : vector<16x384xf32>
      %38 = tpu.matmul %36, %37, %cst_22 {dimension_numbers = #tpu.dot_dimension_numbers<[1], [0], [0], [1], [0, 0, 1, 1], [], []>} : vector<16x128xbf16>, vector<128x384xbf16>, vector<16x384xf32> -> vector<16x384xf32>
      %c0_23 = arith.constant 0 : index
      %c0_24 = arith.constant 0 : index
      %39 = vector.load %arg3[%c0_23, %c0_24] : memref<1x384xf32, #tpu.memory_space<vmem>>, vector<1x384xf32>
      %40 = vector.broadcast %39 : vector<1x384xf32> to vector<16x384xf32>
      %41 = arith.addf %38, %40 : vector<16x384xf32>
      %42 = vector.shape_cast %41 : vector<16x384xf32> to vector<2x8x384xf32>
      %c0_25 = arith.constant 0 : index
      %c0_26 = arith.constant 0 : index
      %c0_27 = arith.constant 0 : index
      %43 = vector.load %arg7[%c0_25, %c0_26, %c0_27] : memref<2x8x384xf32, #tpu.memory_space<vmem>>, vector<2x8x384xf32>
      tpu.vector_store %arg7[%c0_25, %c0_26, %c0_27], %42 {strides = array<i32>} : memref<2x8x384xf32, #tpu.memory_space<vmem>>, vector<2x8x384xf32>,
    } else {
    }
    %c8_i32 = arith.constant 8 : i32
    %3 = arith.muli %arg0, %c8_i32 : i32
    %4 = tpu.assume_multiple %3, 8 : i32
    %c0 = arith.constant 0 : index
    %5 = arith.index_cast %4 : i32 to index
    %c0_1 = arith.constant 0 : index
    %6 = vector.load %arg7[%c0, %5, %c0_1] : memref<2x8x384xf32, #tpu.memory_space<vmem>>, vector<2x8x128xf32>
    %c0_2 = arith.constant 0 : index
    %c0_3 = arith.constant 0 : index
    %c128 = arith.constant 128 : index
    %7 = vector.load %arg7[%c0_2, %c0_3, %c128] : memref<2x8x384xf32, #tpu.memory_space<vmem>>, vector<2x8x128xf32>
    %c0_4 = arith.constant 0 : index
    %c0_5 = arith.constant 0 : index
    %c256 = arith.constant 256 : index
    %8 = vector.load %arg7[%c0_4, %c0_5, %c256] : memref<2x8x384xf32, #tpu.memory_space<vmem>>, vector<2x8x128xf32>
    %9 = arith.truncf %6 : vector<2x8x128xf32> to vector<2x8x128xbf16>
    %10 = arith.truncf %7 : vector<2x8x128xf32> to vector<2x8x128xbf16>
    "tpu.trace_start"() <{level = 10 : i32, message = "bnd,bmd->bnm"}> : () -> ()
    %cst = arith.constant dense<0.000000e+00> : vector<2x8x8xf32>
    %11 = tpu.matmul %9, %10, %cst {dimension_numbers = #tpu.dot_dimension_numbers<[2], [2], [1], [1], [0, 0, 0, 1, 1, 1], [0], [0]>} : vector<2x8x128xbf16>, vector<2x8x128xbf16>, vector<2x8x8xf32> -> vector<2x8x8xf32>
    "tpu.trace_stop"() : () -> ()
    %cst_6 = arith.constant dense<0xFF800000> : vector<8x8xf32>
    %12 = vector.multi_reduction <maximumf>, %11, %cst_6 [0] : vector<2x8x8xf32> to vector<8x8xf32>
    %13 = vector.shape_cast %12 : vector<8x8xf32> to vector<1x8x8xf32>
    %14 = vector.broadcast %13 : vector<1x8x8xf32> to vector<2x8x8xf32>
    %15 = arith.subf %11, %14 : vector<2x8x8xf32>
    %16 = math.exp %15 : vector<2x8x8xf32>
    %cst_7 = arith.constant dense<0.000000e+00> : vector<8x8xf32>
    %17 = vector.multi_reduction <add>, %16, %cst_7 [0] : vector<2x8x8xf32> to vector<8x8xf32>
    %18 = vector.shape_cast %17 : vector<8x8xf32> to vector<1x8x8xf32>
    %19 = tpu.reciprocal %18 {approx = true} : vector<1x8x8xf32> -> vector<1x8x8xf32>
    %20 = vector.broadcast %19 : vector<1x8x8xf32> to vector<2x8x8xf32>
    %21 = arith.mulf %16, %20 : vector<2x8x8xf32>
    %22 = arith.truncf %21 : vector<2x8x8xf32> to vector<2x8x8xbf16>
    %23 = arith.truncf %8 : vector<2x8x128xf32> to vector<2x8x128xbf16>
    "tpu.trace_start"() <{level = 10 : i32, message = "bnm,bmd->bnd"}> : () -> ()
    %cst_8 = arith.constant dense<0.000000e+00> : vector<2x8x128xf32>
    %24 = tpu.matmul %22, %23, %cst_8 {dimension_numbers = #tpu.dot_dimension_numbers<[2], [1], [1], [2], [0, 0, 0, 1, 1, 2], [0], [0]>} : vector<2x8x8xbf16>, vector<2x8x128xbf16>, vector<2x8x128xf32> -> vector<2x8x128xf32>
    "tpu.trace_stop"() : () -> ()
    %25 = vector.shape_cast %24 : vector<2x8x128xf32> to vector<16x128xf32>
    %26 = arith.truncf %25 : vector<16x128xf32> to vector<16x128xbf16>
    %c0_9 = arith.constant 0 : index
    %c0_10 = arith.constant 0 : index
    %27 = vector.load %arg4[%c0_9, %c0_10] : memref<128x128xbf16, #tpu.memory_space<vmem>>, vector<128x128xbf16>
    %cst_11 = arith.constant dense<0.000000e+00> : vector<16x128xf32>
    %28 = tpu.matmul %26, %27, %cst_11 {dimension_numbers = #tpu.dot_dimension_numbers<[1], [0], [0], [1], [0, 0, 1, 1], [], []>} : vector<16x128xbf16>, vector<128x128xbf16>, vector<16x128xf32> -> vector<16x128xf32>
    %c0_12 = arith.constant 0 : index
    %c0_13 = arith.constant 0 : index
    %29 = vector.load %arg5[%c0_12, %c0_13] : memref<1x128xf32, #tpu.memory_space<vmem>>, vector<1x128xf32>
    %30 = vector.broadcast %29 : vector<1x128xf32> to vector<16x128xf32>
    %31 = arith.addf %28, %30 : vector<16x128xf32>
    %32 = vector.shape_cast %31 : vector<16x128xf32> to vector<2x8x128xf32>
    %c0_14 = arith.constant 0 : index
    %c0_15 = arith.constant 0 : index
    %c0_16 = arith.constant 0 : index
    %33 = vector.load %arg6[%c0_14, %c0_15, %c0_16] : memref<2x8x128xf32, #tpu.memory_space<vmem>>, vector<2x8x128xf32>
    tpu.vector_store %arg6[%c0_14, %c0_15, %c0_16], %32 {strides = array<i32>} : memref<2x8x128xf32, #tpu.memory_space<vmem>>, vector<2x8x128xf32>,
    return
  }
  func.func @transform_0(%arg0: i32) -> (i32, i32, i32) {
    %c0_i32 = arith.constant 0 : i32
    %c0_i32_0 = arith.constant 0 : i32
    %c0_i32_1 = arith.constant 0 : i32
    %c0_i32_2 = arith.constant 0 : i32
    return %c0_i32, %c0_i32_0, %c0_i32_1 : i32, i32, i32
  }
  func.func @transform_1(%arg0: i32) -> (i32, i32) {
    %c0_i32 = arith.constant 0 : i32
    %c0_i32_0 = arith.constant 0 : i32
    %c0_i32_1 = arith.constant 0 : i32
    return %c0_i32, %c0_i32_0 : i32, i32
  }
  func.func @transform_2(%arg0: i32) -> (i32, i32) {
    %c0_i32 = arith.constant 0 : i32
    %c0_i32_0 = arith.constant 0 : i32
    %c0_i32_1 = arith.constant 0 : i32
    return %c0_i32, %c0_i32_0 : i32, i32
  }
  func.func @transform_3(%arg0: i32) -> (i32, i32) {
    %c0_i32 = arith.constant 0 : i32
    %c0_i32_0 = arith.constant 0 : i32
    %c0_i32_1 = arith.constant 0 : i32
    return %c0_i32, %c0_i32_0 : i32, i32
  }
  func.func @transform_4(%arg0: i32) -> (i32, i32) {
    %c0_i32 = arith.constant 0 : i32
    %c0_i32_0 = arith.constant 0 : i32
    %c0_i32_1 = arith.constant 0 : i32
    return %c0_i32, %c0_i32_0 : i32, i32
  }
  func.func @transform_5(%arg0: i32) -> (i32, i32, i32) {
    %c0_i32 = arith.constant 0 : i32
    %c0_i32_0 = arith.constant 0 : i32
    %c0_i32_1 = arith.constant 0 : i32
    return %c0_i32, %arg0, %c0_i32_0 : i32, i32, i32
  }
}

</mosaic_0001>

<bundles_post_ra>
// kernel: tiny_attention.1
= control target key start
LH: loop header
LB: loop body
LE: loop exit
PB: predicated region body
PF: predicated region fallthrough
CT: control target
= control target key end

     0   :  { %10 = vsyncpa [#allocation4], 0  ;;  %s933_s0 = inlined_call_operand.hbm [shape: f32[2,8,128], index: 0, kind: input, shape index: {}]   ;;  %s934_s1 = inlined_call_operand.hbm [shape: bf16[128,384], index: 1, kind: input, shape index: {}]   ;;  %s935_s2 = inlined_call_operand.hbm [shape: f32[1,384], index: 2, kind: input, shape index: {}]   ;;  %s936_s3 = inlined_call_operand.hbm [shape: bf16[128,128], index: 3, kind: input, shape index: {}]   ;;  %s937_s4 = inlined_call_operand.hbm [shape: f32[1,128], index: 4, kind: input, shape index: {}]   ;;  %s938_s5 = inlined_call_operand.hbm [shape: f32[2,8,128], index: 5, kind: output, shape index: {}]  }
   0x1   :  { %11 = vsyncpa [#allocation7], 0 }
   0x2   :  { %12 = vsyncpa [#allocation10], 0  ;;  %s31_s20 = sshll.u32 %s934_s1, 4  ;;  %s32_s20 = int_to_ptr.hbm [resolvable:$true] %s31_s20 }
   0x3   :  { %13 = vsyncpa [#allocation5], 0  ;;  %s861_s21 = smov [#allocation6]   ;;  %s55_s25 = sshll.u32 %s936_s3, 4  ;;  %s56_s25 = int_to_ptr.hbm [resolvable:$true] %s55_s25 }
   0x4   :  { %s33_s22 = sshll.u32 %s861_s21, 4  ;;  %s862_s26 = smov 192   ;;  %s34_s22 = int_to_ptr.vmem [resolvable:$true] %s33_s22 }
   0x5   :  { %s863_s27 = smov 12   ;;  %s864_s28 = smov [#allocation9]  }
   0x6   :  { %39 = dma.hbm_to_vmem [thread:$0]  %s32_s20, 3072, %s34_s22, [#allocation7], %s862_s26, %s862_s26, %s863_s27  }
   0x7   :  { %s57_s29 = sshll.u32 %s864_s28, 4  ;;  %s865_s30 = smov 64   ;;  %s58_s29 = int_to_ptr.vmem [resolvable:$true] %s57_s29 }
   0x8   :  { %s866_s6 = smov 4   ;;  %s18_s8 = sshll.u32 %s933_s0, 4  ;;  %s19_s8 = int_to_ptr.hbm [resolvable:$true] %s18_s8 }
   0x9   :  { %63 = dma.hbm_to_vmem [thread:$0]  %s56_s25, 1024, %s58_s29, [#allocation10], %s865_s30, %s865_s30, %s866_s6  }
   0xa   :  { %s867_s9 = smov [#allocation3]   ;;  %s45_s12 = sshll.u32 %s935_s2, 4  ;;  %s46_s12 = int_to_ptr.hbm [resolvable:$true] %s45_s12 }
   0xb   :  { %s20_s10 = sshll.u32 %s867_s9, 4  ;;  %s868_s13 = smov 128   ;;  %s21_s10 = int_to_ptr.vmem [resolvable:$true] %s20_s10 }
   0xc   :  { %s869_s14 = smov 8   ;;  %s870_s15 = smov [#allocation8]  }
   0xd   :  { %26 = dma.hbm_to_vmem [thread:$0]  %s19_s8, 256, %s21_s10, [#allocation4], %s868_s13, %s868_s13, %s869_s14  }
   0xe   :  { %s47_s16 = sshll.u32 %s870_s15, 4  ;;  %s69_s0 = sshll.u32 %s937_s4, 4  ;;  %s48_s16 = int_to_ptr.vmem [resolvable:$true] %s47_s16  ;;  %s70_s0 = int_to_ptr.hbm [resolvable:$true] %s69_s0 }
   0xf   :  { %50 = dma.hbm_to_vmem [thread:$0]  %s46_s12, 48, %s48_s16, [#allocation7]  }
  0x10   :  { %s871_s19 = smov [#allocation11]  }
  0x11   :  { %s71_s20 = sshll.u32 %s871_s19, 4  ;;  %s72_s20 = int_to_ptr.vmem [resolvable:$true] %s71_s20 }
  0x12   :  { %74 = dma.hbm_to_vmem [thread:$0]  %s70_s0, 16, %s72_s20, [#allocation10]  }
  0x13   :  { %853 = dma.done.wait [#allocation4], 256  }
  0x14   :  { %854 = vsyncadd [#allocation4], 4294967040 }
  0x15   :  { %855 = dma.done.wait [#allocation7], 3120  }
  0x16   :  { %856 = vsyncadd [#allocation7], 4294964176 }
  0x17   :  { %857 = dma.done.wait [#allocation10], 1040  }
  0x18   :  { %858 = vsyncadd [#allocation10], 4294966256  ;;  %v614_v0 = vld [vmem:[#allocation6 + $0xa8] sm:$0xf]  ;;  %v680_v1 = vld [vmem:[#allocation6 + $0xb0] sm:$0xf0] }
  0x19   :  { %v679_v2 = vld [vmem:[#allocation6 + $0xac] sm:$0xf]  ;;  %v615_v3 = vor.u32 %v680_v1, %v614_v0  ;;  %v616_v4 = vld [vmem:[#allocation6 + $0xb4] sm:$0xf0]  ;;  %v602_v5 = vld [vmem:[#allocation6 + $0x90] sm:$0xf] }
  0x1a   :  { %v677_v6 = vld [vmem:[#allocation6 + $0x98] sm:$0xf0]  ;;  %v619_v7 = vor.u32 %v679_v2, %v616_v4  ;;  %v676_v8 = vld [vmem:[#allocation6 + $0x94] sm:$0xf]  ;;  %v604_v9 = vld [vmem:[#allocation6 + $0x9c] sm:$0xf0] }
  0x1b   :  { %271 = vmatpush.bf16.msra.mxu0 %v615_v3  ;;  %v603_v10 = vor.u32 %v677_v6, %v602_v5  ;;  %v607_v11 = vor.u32 %v676_v8, %v604_v9  ;;  %v590_v12 = vld [vmem:[#allocation6 + $0x78] sm:$0xf]  ;;  %v674_v13 = vld [vmem:[#allocation6 + $0x80] sm:$0xf0]  ;;  %v673_v14 = vld [vmem:[#allocation6 + $0x7c] sm:$0xf] }
  0x1c   :  { %285 = vmatpush.bf16.msra.mxu1 %v619_v7  ;;  %v592_v15 = vld [vmem:[#allocation6 + $0x84] sm:$0xf0]  ;;  %v591_v16 = vor.u32 %v674_v13, %v590_v12  ;;  %v578_v18 = vld [vmem:[#allocation6 + $0x60] sm:$0xf]  ;;  %v671_v19 = vld [vmem:[#allocation6 + $0x68] sm:$0xf0] }
  0x1d   :  { %v595_v17 = vor.u32 %v673_v14, %v592_v15  ;;  %v670_v20 = vld [vmem:[#allocation6 + $0x64] sm:$0xf]  ;;  %v580_v21 = vld [vmem:[#allocation6 + $0x6c] sm:$0xf0]  ;;  %v579_v22 = vor.u32 %v671_v19, %v578_v18  ;;  %v566_v23 = vld [vmem:[#allocation6 + $0x48] sm:$0xf] }
  0x1e   :  { %v622_v24 = vld [vmem:[#allocation6 + $0xb0] sm:$0xf]  ;;  %v681_v25 = vld [vmem:[#allocation6 + $0xb8] sm:$0xf0]  ;;  %v583_v26 = vor.u32 %v670_v20, %v580_v21  ;;  %v668_v27 = vld [vmem:[#allocation6 + $0x50] sm:$0xf0] }
  0x1f   :  { %272 = vmatpush.bf16.msra.mxu0 %v603_v10  ;;  %v623_v28 = vor.u32 %v681_v25, %v622_v24  ;;  %v610_v29 = vld [vmem:[#allocation6 + $0x98] sm:$0xf]  ;;  %v678_v30 = vld [vmem:[#allocation6 + $0xa0] sm:$0xf0]  ;;  %v667_v31 = vld [vmem:[#allocation6 + $0x4c] sm:$0xf]  ;;  %v567_v34 = vor.u32 %v668_v27, %v566_v23 }
  0x20   :  { %286 = vmatpush.bf16.msra.mxu1 %v607_v11  ;;  %v568_v32 = vld [vmem:[#allocation6 + $0x54] sm:$0xf0]  ;;  %v611_v33 = vor.u32 %v678_v30, %v610_v29  ;;  %v554_v36 = vld [vmem:[#allocation6 + $0x30] sm:$0xf]  ;;  %v665_v37 = vld [vmem:[#allocation6 + $0x38] sm:$0xf0] }
  0x21   :  { %299 = vmatpush.bf16.msra.mxu2 %v623_v28  ;;  %v571_v35 = vor.u32 %v667_v31, %v568_v32  ;;  %v664_v38 = vld [vmem:[#allocation6 + $0x34] sm:$0xf]  ;;  %v556_v39 = vld [vmem:[#allocation6 + $0x3c] sm:$0xf0]  ;;  %v555_v40 = vor.u32 %v665_v37, %v554_v36  ;;  %v542_v42 = vld [vmem:[#allocation6 + $0x18] sm:$0xf] }
  0x22   :  { %v559_v41 = vor.u32 %v664_v38, %v556_v39  ;;  %v662_v43 = vld [vmem:[#allocation6 + $0x20] sm:$0xf0]  ;;  %v661_v44 = vld [vmem:[#allocation6 + $0x1c] sm:$0xf]  ;;  %v544_v45 = vld [vmem:[#allocation6 + $0x24] sm:$0xf0] }
  0x23   :  { %273 = vmatpush.bf16.msra.mxu0 %v591_v16  ;;  %v543_v46 = vor.u32 %v662_v43, %v542_v42  ;;  %v547_v47 = vor.u32 %v661_v44, %v544_v45  ;;  %v530_v48 = vld [vmem:[#allocation6] sm:$0xf]  ;;  %v659_v49 = vld [vmem:[#allocation6 + $0x8] sm:$0xf0]  ;;  %v658_v50 = vld [vmem:[#allocation6 + $0x4] sm:$0xf] }
  0x24   :  { %287 = vmatpush.bf16.msra.mxu1 %v595_v17  ;;  %v532_v51 = vld [vmem:[#allocation6 + $0xc] sm:$0xf0]  ;;  %v531_v52 = vor.u32 %v659_v49, %v530_v48  ;;  %v101_v54 = vld [vmem:[#allocation3 + $0x8] sm:$0xff]  ;;  %v598_v57 = vld [vmem:[#allocation6 + $0x80] sm:$0xf]  ;;  %vm384_vm0 = vcmask 1043456  }
  0x25   :  { %300 = vmatpush.bf16.msra.mxu2 %v611_v33  ;;  %v100_v53 = vld [vmem:[#allocation3] sm:$0xff]  ;;  %v535_v55 = vor.u32 %v658_v50, %v532_v51  ;;  %v675_v58 = vld [vmem:[#allocation6 + $0x88] sm:$0xf0]  ;;  %v586_v60 = vld [vmem:[#allocation6 + $0x68] sm:$0xf]  ;;  %vm361_vm1 = vcmask 64512  }
  0x26   :  { %v102_v56 = vpack.c.bf16 %v101_v54, %v100_v53  ;;  %v599_v59 = vor.u32 %v675_v58, %v598_v57  ;;  %v672_v61 = vld [vmem:[#allocation6 + $0x70] sm:$0xf0]  ;;  %v574_v63 = vld [vmem:[#allocation6 + $0x50] sm:$0xf]  ;;  %v669_v0 = vld [vmem:[#allocation6 + $0x58] sm:$0xf0] }
  0x27   :  { %274 = vmatpush.bf16.msra.mxu0 %v579_v22  ;;  %v587_v62 = vor.u32 %v672_v61, %v586_v60  ;;  %v575_v1 = vor.u32 %v669_v0, %v574_v63  ;;  %v562_v2 = vld [vmem:[#allocation6 + $0x38] sm:$0xf]  ;;  %v666_v3 = vld [vmem:[#allocation6 + $0x40] sm:$0xf0]  ;;  %v550_v5 = vld [vmem:[#allocation6 + $0x20] sm:$0xf] }
  0x28   :  { %288 = vmatpush.bf16.msra.mxu1 %v583_v26  ;;  %v563_v4 = vor.u32 %v666_v3, %v562_v2  ;;  %v663_v6 = vld [vmem:[#allocation6 + $0x28] sm:$0xf0]  ;;  %v538_v8 = vld [vmem:[#allocation6 + $0x8] sm:$0xf]  ;;  %v660_v9 = vld [vmem:[#allocation6 + $0x10] sm:$0xf0] }
  0x29   :  { %301 = vmatpush.bf16.msra.mxu2 %v599_v59  ;;  %v551_v7 = vor.u32 %v663_v6, %v550_v5  ;;  %v539_v10 = vor.u32 %v660_v9, %v538_v8  ;;  %v135_v11 = vld [vmem:[#allocation8] sm:$0x7]  ;;  %v688_v39 = vld [vmem:[#allocation9 + $0x30] sm:$0xff]  ;;  %v687_v45 = vld [vmem:[#allocation9 + $0x28] sm:$0xff]  ;;  %s872_s2 = smov [#allocation12]   ;;  %s511_s23 = sshll.u32 %s938_s5, 4  ;;  %s512_s23 = int_to_ptr.hbm [resolvable:$true] %s511_s23 }
  0x2a   :  { %v138_v12 = vperm.slane %v135_v11, 1  ;;  %v137_v13 = vperm.slane %v135_v11, 0  ;;  %v139_v26 = vperm.slane %v135_v11, 2  ;;  %v689_v37 = vld [vmem:[#allocation9 + $0x38] sm:$0xff]  ;;  %v686_v49 = vld [vmem:[#allocation9 + $0x20] sm:$0xff]  ;;  %s509_s4 = sshll.u32 %s872_s2, 4  ;;  %s510_s4 = int_to_ptr.vmem [resolvable:$true] %s509_s4 }
  0x2b   :  { %275 = vmatpush.bf16.msra.mxu0 %v567_v34  ;;  %v685_v50 = vld [vmem:[#allocation9 + $0x18] sm:$0xff]  ;;  %v682_v63 = vld [vmem:[#allocation9] sm:$0xff] }
  0x2c   :  { %289 = vmatpush.bf16.msra.mxu1 %v571_v35  ;;  %v702_v5 = vld [vmem:[#allocation11] ss:$0 sm:$0xff] }
  0x2d   :  { %302 = vmatpush.bf16.msra.mxu2 %v587_v62  ;;  %v683_v62 = vld [vmem:[#allocation9 + $0x8] sm:$0xff] }
  0x2f   :  { %276 = vmatpush.bf16.msra.mxu0 %v555_v40 }
  0x30   :  { %290 = vmatpush.bf16.msra.mxu1 %v559_v41 }
  0x31   :  { %303 = vmatpush.bf16.msra.mxu2 %v575_v1 }
  0x33   :  { %277 = vmatpush.bf16.msra.mxu0 %v543_v46 }
  0x34   :  { %291 = vmatpush.bf16.msra.mxu1 %v547_v47 }
  0x35   :  { %304 = vmatpush.bf16.msra.mxu2 %v563_v4 }
  0x37   :  { %278 = vmatpush.bf16.msra.mxu0 %v531_v52 }
  0x38   :  { %292 = vmatpush.bf16.msra.mxu1 %v535_v55  ;;  %v684_v55 = vld [vmem:[#allocation9 + $0x10] sm:$0xff] }
  0x39   :  { %305 = vmatpush.bf16.msra.mxu2 %v551_v7 }
  0x3a   :  { %279 = vmatmul.bf16.vlgmr.msra.gmra.mxu0 %v102_v56 }
  0x3b   :  { %293 = vmatmul.bf16.vlgmr.msra.gmra.mxu1 %v102_v56 }
  0x3c   :  { %489 = vmatpush.bf16.msrb.mxu1 %v689_v37 }
  0x3d   :  { %306 = vmatpush.bf16.msra.mxu2 %v539_v10 }
  0x40   :  { %307 = vmatmul.bf16.vlgmr.msra.gmra.mxu2 %v102_v56  ;;  %490 = vmatpush.bf16.msrb.mxu1 %v688_v39 }
  0x44   :  { %491 = vmatpush.bf16.msrb.mxu1 %v687_v45 }
  0x48   :  { %492 = vmatpush.bf16.msrb.mxu1 %v686_v49 }
  0x4c   :  { %493 = vmatpush.bf16.msrb.mxu1 %v685_v50 }
  0x50   :  { %494 = vmatpush.bf16.msrb.mxu1 %v684_v55 }
  0x54   :  { %495 = vmatpush.bf16.msrb.mxu1 %v683_v62 }
  0x58   :  { %496 = vmatpush.bf16.msrb.mxu1 %v682_v63 }
  0xb7   :  { %v280_v16 = vpop.f32.mrf.mxu0 }
  0xb8   :  { %v294_v14 = vpop.f32.mrf.mxu1  ;;  %v281_v18 = vadd.f32 %v280_v16, %v137_v13 }
  0xb9   :  { %v295_v15 = vadd.f32 %v294_v14, %v138_v12 }
  0xba   :  { %v331_v19 = vpack.c.bf16 %v281_v18, %v281_v18 }
  0xbb   :  { %v333_v17 = vpack.c.bf16 %v295_v15, %v295_v15 }
  0xbd   :  { %342 = vmatpush.bf16.xpose.msra.mxu3 %v333_v17 }
  0xbf   :  { %v282_v23 = vpop.f32.mrf.mxu0 }
  0xc0   :  { %v296_v20 = vpop.f32.mrf.mxu1  ;;  %v283_v24 = vadd.f32 %v282_v23, %v137_v13 }
  0xc1   :  { %v297_v21 = vadd.f32 %v296_v20, %v138_v12 }
  0xc2   :  { %v332_v25 = vpack.c.bf16 %v283_v24, %v283_v24 }
  0xc3   :  { %v334_v22 = vpack.c.bf16 %v297_v21, %v297_v21  ;;  %v308_v27 = vpop.f32.mrf.mxu2 }
  0xc4   :  { %343 = vmatmul.bf16.vlgmr.msra.gmra.mxu3 %v331_v19  ;;  %v309_v28 = vadd.f32 %v308_v27, %v139_v26 }
  0xc5   :  { %355 = vmatpush.bf16.xpose.msrb.mxu3 %v334_v22 }
  0xc6   :  { %v379_v29 = vpack.c.bf16 %v309_v28, %v309_v28 }
  0xc8   :  { %v386_v30 = vsel %vm384_vm0, %v379_v29, 0 }
  0xcb   :  { %v310_v32 = vpop.f32.mrf.mxu2 }
  0xcc   :  { %v311_v33 = vadd.f32 %v310_v32, %v139_v26 }
  0xcd   :  { %395 = vmatpush.bf16.msra.mxu3 %v386_v30 }
  0xce   :  { %v380_v34 = vpack.c.bf16 %v311_v33, %v311_v33 }
  0xd0   :  { %v405_v36 = vsel %vm384_vm0, %v380_v34, 0 }
  0xd1   :  { %414 = vmatpush.bf16.msrb.mxu0 %v405_v36 }
  0xd4   :  { %356 = vmatmul.bf16.vlgmr.msrb.gmra.mxu3 %v332_v25 }
 0x147   :  { %v344_v31 = vpop.f32.mrf.mxu3 }
 0x148   :  { %v362_v40 = vsel %vm361_vm1, %v344_v31, -inf }
 0x14f   :  { %v346_v35 = vpop.f32.mrf.mxu3 }
 0x157   :  { %v357_v38 = vpop.f32.mrf.mxu3 }
 0x158   :  { %v363_v41 = vsel %vm361_vm1, %v357_v38, -inf }
 0x159   :  { %v364_v42 = vmax.f32 %v362_v40, %v363_v41 }
 0x15b   :  { %v365_v43 = vsub.f32 %v344_v31, %v364_v42  ;;  %v366_v44 = vsub.f32 %v357_v38, %v364_v42 }
 0x15d   :  { %v367_v46 = vmul.f32 1.442695, %v365_v43  ;;  %v369_v47 = vmul.f32 1.442695, %v366_v44 }
 0x15f   :  { %703 = vpow2.f32 %v367_v46  ;;  %v359_v48 = vpop.f32.mrf.mxu3 }
 0x160   :  { %705 = vpow2.f32 %v369_v47 }
 0x165   :  { %v704_v51 = vpop.eup %703 }
 0x166   :  { %v706_v52 = vpop.eup %705  ;;  %v371_v53 = vsel %vm361_vm1, %v704_v51, 0.0 }
 0x167   :  { %v372_v54 = vsel %vm361_vm1, %v706_v52, 0.0 }
 0x168   :  { %v373_v56 = vadd.f32 %v372_v54, %v371_v53 }
 0x16a   :  { %707 = vrcp.f32 %v373_v56 }
 0x170   :  { %v708_v57 = vpop.eup %707 }
 0x171   :  { %v375_v58 = vmul.f32 %v708_v57, %v704_v51  ;;  %v376_v59 = vmul.f32 %v708_v57, %v706_v52 }
 0x173   :  { %v377_v60 = vpack.c.bf16 %v375_v58, %v375_v58  ;;  %v378_v61 = vpack.c.bf16 %v376_v59, %v376_v59 }
 0x175   :  { %624 = vmatmul.msk.bf16.vlgmr.msra.gmra.mxu3 %vm361_vm1, %v377_v60  ;;  %625 = vmatmul.msk.bf16.vlgmr.msrb.gmra.mxu0 %vm361_vm1, %v378_v61 }
 0x1f2   :  { %v416_v0 = vpop.f32.mrf.mxu0 }
 0x1f8   :  { %v397_v1 = vpop.f32.mrf.mxu3 }
 0x1f9   :  { %v420_v2 = vpack.c.bf16 %v416_v0, %v397_v1 }
 0x1fa   :  { %v418_v3 = vpop.f32.mrf.mxu0 }
 0x1fb   :  { %497 = vmatmul.bf16.vlgmr.msrb.gmra.mxu1 %v420_v2 }
 0x200   :  { %v399_v4 = vpop.f32.mrf.mxu3 }
 0x278   :  { %v498_v6 = vpop.f32.mrf.mxu1 }
 0x279   :  { %v499_v7 = vadd.f32 %v702_v5, %v498_v6 }
 0x27b   :  { %503 = vst [vmem:[#allocation12] sm:$0xff] %v499_v7 }
 0x280   :  { %v500_v8 = vpop.f32.mrf.mxu1 }
 0x281   :  { %v501_v9 = vadd.f32 %v702_v5, %v500_v8 }
 0x283   :  { %504 = vst [vmem:[#allocation12 + $0x8] sm:$0xff] %v501_v9 }
 0x284   :  { %517 = dma.vmem_to_hbm [thread:$0]  %s510_s4, 256, %s512_s23, [#allocation5], %s868_s13, %s868_s13, %s869_s14  }
 0x285   :  { %859 = dma.done.wait [#allocation5], 256  }
 0x286   :  { %860 = vsyncadd [#allocation5], 4294967040 }
 0x287   :  { %522 = vsyncpa [#allocation4], 1 }
 0x288   :  { %523 = vsyncpa [#allocation7], 1 }
 0x289   :  { %524 = vsyncpa [#allocation10], 1 }
 0x28a   :  { %525 = vsyncpa [#allocation5], 1 }

</bundles_post_ra>
